<compile_context>
chip_gen: v7x
topology: tpu7x:2x2x1
jax: 0.10.0
libtpu: 0.0.40
codegen_flags: <defaults>
</compile_context>

<pallas_src>
import functools

import jax
import jax.numpy as jnp
from jax.experimental import pallas as pl
from jax.experimental.pallas import tpu as pltpu


# ---------------------------------------------------------------------------
# Kernels
# ---------------------------------------------------------------------------

def _se_kernel(x_ref, w1_ref, w2_ref, o_ref):
    """Single-pass SE: whole (nb, C, HW) batch block resident in VMEM."""
    # x_ref : (nb, C, HW)   spatial positions on lanes
    # w1_ref: (C, Cr)       conv1 weight (Cr, C, 1, 1) transposed
    # w2_ref: (Cr, C)       conv2 weight (C, Cr, 1, 1) transposed
    x = x_ref[...]                                     # native dtype

    # Squeeze: global average pool over spatial (lane) axis, accumulated in f32.
    pooled = jnp.mean(x, axis=-1, dtype=jnp.float32)   # (nb, C)

    # Excitation: batched FC -> ReLU -> FC -> Sigmoid, all in f32 (tiny FLOPs).
    h = jnp.maximum(
        jnp.dot(pooled, w1_ref[...], preferred_element_type=jnp.float32), 0.0
    )                                                  # (nb, Cr)
    gate = jax.nn.sigmoid(
        jnp.dot(h, w2_ref[...], preferred_element_type=jnp.float32)
    )                                                  # (nb, C)

    # Scale: broadcast per-(batch, channel) gate over spatial, native dtype.
    o_ref[...] = (x * gate.astype(o_ref.dtype)[:, :, None]).astype(o_ref.dtype)


def _se_pool_gate_kernel(x_ref, w1_ref, w2_ref, gate_ref, acc_ref, *, hw_total):
    """Two-pass fallback, pass A: pooled-sum reduction over HW tiles -> gate."""
    s = pl.program_id(1)

    @pl.when(s == 0)
    def _():
        acc_ref[...] = jnp.zeros_like(acc_ref)

    # Partial spatial sum of this HW tile, accumulated in f32.
    acc_ref[...] += jnp.sum(x_ref[...], axis=-1, dtype=jnp.float32)   # (nb, C)

    @pl.when(s == pl.num_programs(1) - 1)
    def _():
        pooled = acc_ref[...] * (1.0 / hw_total)                      # (nb, C)
        h = jnp.maximum(
            jnp.dot(pooled, w1_ref[...], preferred_element_type=jnp.float32), 0.0
        )
        gate_ref[...] = jax.nn.sigmoid(
            jnp.dot(h, w2_ref[...], preferred_element_type=jnp.float32)
        )


def _se_scale_kernel(x_ref, gate_ref, o_ref):
    """Two-pass fallback, pass B: rescale one (nb, C, hw_tile) tile."""
    x = x_ref[...]
    g = gate_ref[...].astype(o_ref.dtype)              # (nb, C)
    o_ref[...] = (x * g[:, :, None]).astype(o_ref.dtype)


# ---------------------------------------------------------------------------
# Host-side helpers (all trace-time Python)
# ---------------------------------------------------------------------------

def _vmem_budget_bytes(frac=0.75, default_capacity=64 << 20):
    """Generation-aware VMEM budget: ~75% of physical VMEM for this chip.

    Falls back to the most conservative listed generation (v7x, 64 MiB/TC)
    if the hardware query is unavailable.
    """
    try:
        cap = int(pltpu.get_tpu_info().vmem_capacity_bytes)
    except Exception:
        cap = default_capacity
    return int(cap * frac)


def _pick_batch_block(n, bytes_per_elem, *, target_bytes, max_bytes, min_steps=8):
    """Batch elements per grid step (divisor of n).

    Targets ~`target_bytes` blocks but enforces a grid-step floor of
    min(min_steps, n) steps so the double-buffer always has work to overlap
    and v7x can shard the batch axis across both TensorCores (>= ~4 pipelined
    steps per core).  The step floor dominates the byte target when N is small.
    """
    cap_bytes = max(1, min(target_bytes, max_bytes))
    nb = max(1, min(n, cap_bytes // max(bytes_per_elem, 1)))
    nb = min(nb, max(1, n // min(min_steps, n)))       # grid-step floor
    nb = int(nb)
    while n % nb != 0:
        nb -= 1
    return nb


def _pick_hw_tile(hw, c, itemsize, *, target_bytes, max_bytes):
    """Spatial tile (divisor of HW) for the two-pass fallback.

    Prefers the largest 128-multiple divisor (lane-aligned, unmasked stores);
    otherwise takes the largest divisor that fits (masked stores, still correct).
    """
    cap = min(target_bytes, max_bytes) // max(c * itemsize, 1)
    cap = max(1, min(hw, int(cap)))
    best, best_aligned = 1, 0
    for d in range(1, cap + 1):
        if hw % d == 0:
            best = d
            if d % 128 == 0:
                best_aligned = d
    return best_aligned if best_aligned else best


# ---------------------------------------------------------------------------
# pallas_call wrappers
# ---------------------------------------------------------------------------

def _se_single_pass(x, w1_k, w2_k, *, max_block_bytes, vmem_budget,
                    target_bytes=4 << 20, min_steps=8):
    N, C, HW = x.shape
    Cr = w1_k.shape[1]
    itemsize = jnp.dtype(x.dtype).itemsize

    nb = _pick_batch_block(N, C * HW * itemsize, target_bytes=target_bytes,
                           max_bytes=max_block_bytes, min_steps=min_steps)

    # NOTE: weights are a few KB after lane padding; keeping them on the
    # default double-buffer is negligible, so no pipeline_mode override here.
    return pl.pallas_call(
        _se_kernel,
        out_shape=jax.ShapeDtypeStruct((N, C, HW), x.dtype),
        grid_spec=pltpu.PrefetchScalarGridSpec(
            num_scalar_prefetch=0,
            grid=(N // nb,),
            in_specs=[
                # nb batch elements per grid step; (C, HW) tile, HW on lanes.
                pl.BlockSpec((nb, C, HW), lambda n: (n, 0, 0)),
                # small weights: full arrays, same block every grid step.
                pl.BlockSpec((C, Cr), lambda n: (0, 0)),
                pl.BlockSpec((Cr, C), lambda n: (0, 0)),
            ],
            out_specs=pl.BlockSpec((nb, C, HW), lambda n: (n, 0, 0)),
        ),
        compiler_params=pltpu.CompilerParams(
            dimension_semantics=("parallel",),
            vmem_limit_bytes=vmem_budget,
        ),
    )(x, w1_k, w2_k)


def _se_two_pass(x, w1_k, w2_k, *, max_block_bytes, vmem_budget,
                 target_bytes=4 << 20):
    """Fallback for elements larger than the VMEM budget: spatially tiled."""
    N, C, HW = x.shape
    Cr = w1_k.shape[1]
    itemsize = jnp.dtype(x.dtype).itemsize

    hw_tile = _pick_hw_tile(HW, C, itemsize,
                            target_bytes=target_bytes, max_bytes=max_block_bytes)
    hw_steps = HW // hw_tile

    # Pass A: pooled-sum reduction over HW tiles (f32 scratch accumulator,
    # "arbitrary" reduction axis last), then excitation -> gate (N, C) f32.
    gate = pl.pallas_call(
        functools.partial(_se_pool_gate_kernel, hw_total=float(HW)),
        out_shape=jax.ShapeDtypeStruct((N, C), jnp.float32),
        grid_spec=pltpu.PrefetchScalarGridSpec(
            num_scalar_prefetch=0,
            grid=(N, hw_steps),
            in_specs=[
                pl.BlockSpec((1, C, hw_tile), lambda b, s: (b, 0, s)),
                pl.BlockSpec((C, Cr), lambda b, s: (0, 0)),
                pl.BlockSpec((Cr, C), lambda b, s: (0, 0)),
            ],
            out_specs=pl.BlockSpec((1, C), lambda b, s: (b, 0)),
            scratch_shapes=[pltpu.VMEM((1, C), jnp.float32)],
        ),
        compiler_params=pltpu.CompilerParams(
            dimension_semantics=("parallel", "arbitrary"),
            vmem_limit_bytes=vmem_budget,
        ),
    )(x, w1_k, w2_k)

    # Pass B: fully parallel rescale over batch x spatial tiles.
    out = pl.pallas_call(
        _se_scale_kernel,
        out_shape=jax.ShapeDtypeStruct((N, C, HW), x.dtype),
        grid_spec=pltpu.PrefetchScalarGridSpec(
            num_scalar_prefetch=0,
            grid=(N, hw_steps),
            in_specs=[
                pl.BlockSpec((1, C, hw_tile), lambda b, s: (b, 0, s)),
                pl.BlockSpec((1, C), lambda b, s: (b, 0)),
            ],
            out_specs=pl.BlockSpec((1, C, hw_tile), lambda b, s: (b, 0, s)),
        ),
        compiler_params=pltpu.CompilerParams(
            dimension_semantics=("parallel", "parallel"),
            vmem_limit_bytes=vmem_budget,
        ),
    )(x, gate)
    return out


def squeeze_excitation(x_nchw, w1, w2, *, max_block_bytes=None):
    """SqueezeExcitation forward.

    x_nchw: (N, C, H, W); w1: (Cr, C) = conv1 weight squeezed; w2: (C, Cr).
    Returns NCHW output of the same dtype as x.
    """
    N, C, H, W = x_nchw.shape
    Cr = w1.shape[0]
    assert w1.shape == (Cr, C) and w2.shape == (C, Cr)
    HW = H * W

    # NCHW -> (N, C, H*W): contiguous reshape, no transpose / extra HBM pass.
    # If HW % 128 != 0 (e.g. 7x7, 14x14 late-stage SE maps) the lane dim is not
    # 128-aligned -> masked stores.  Correct, just slower on the store side;
    # avoiding it would require a layout transpose (an extra HBM pass) which is
    # worse for this memory-bound op.
    x = x_nchw.reshape(N, C, HW)
    w1_k = jnp.transpose(w1)   # (C, Cr)   tiny, negligible cost
    w2_k = jnp.transpose(w2)   # (Cr, C)

    itemsize = jnp.dtype(x.dtype).itemsize
    elem_bytes = C * HW * itemsize
    w_bytes = (w1_k.size + w2_k.size) * jnp.dtype(w1_k.dtype).itemsize

    vmem_budget = _vmem_budget_bytes()
    if max_block_bytes is None:
        # Fast path keeps in + out double-buffered (4 buffers of the big block)
        # plus weights and slack inside the generation-aware budget.
        max_block_bytes = max(1, (vmem_budget - 4 * w_bytes - (2 << 20)) // 4)

    if elem_bytes <= max_block_bytes:
        out = _se_single_pass(x, w1_k, w2_k, max_block_bytes=max_block_bytes,
                              vmem_budget=vmem_budget)
    else:
        out = _se_two_pass(x, w1_k, w2_k, max_block_bytes=max_block_bytes,
                           vmem_budget=vmem_budget)

    # (N, C, H*W) -> NCHW (contiguous reshape, free)
    return out.reshape(N, C, H, W)


# ---------------------------------------------------------------------------
# Reference & test
# ---------------------------------------------------------------------------

def _reference(x_nchw, w1, w2):
    """Pure-JAX reference matching the PyTorch module (bias-free 1x1 convs)."""
    pooled = jnp.mean(x_nchw, axis=(2, 3))                 # (N, C)
    h = jnp.maximum(pooled @ w1.T, 0.0)                    # (N, Cr)
    gate = jax.nn.sigmoid(h @ w2.T)                        # (N, C)
    return x_nchw * gate[:, :, None, None]


if __name__ == "__main__":
    # Module config: channel=8, reduction_ratio=4 -> fc_channel=2
    N, C, H, W = 2, 8, 16, 16
    reduction_ratio = 4
    Cr = C // reduction_ratio
    assert Cr * reduction_ratio == C

    key = jax.random.PRNGKey(0)
    kx, k1, k2, kx2 = jax.random.split(key, 4)
    x = jax.random.normal(kx, (N, C, H, W), dtype=jnp.float32)
    # Deterministic synthetic conv weights (kernel_size=1, bias=False):
    #   conv1.weight: (Cr, C, 1, 1) -> (Cr, C);  conv2.weight: (C, Cr, 1, 1) -> (C, Cr)
    w1 = jax.random.normal(k1, (Cr, C), dtype=jnp.float32) * 0.1
    w2 = jax.random.normal(k2, (C, Cr), dtype=jnp.float32) * 0.1

    # 1) Fast single-pass path (HW = 256, lane-aligned).
    out = jax.block_until_ready(squeeze_excitation(x, w1, w2))
    ref = _reference(x, w1, w2)
    assert out.shape == (N, C, H, W)
    assert jnp.allclose(out, ref, atol=1e-5, rtol=1e-5)

    # 2) Two-pass spatially-tiled fallback, forced by a tiny block budget
    #    (exercises the pooled-reduction accumulator + rescale passes).
    out2 = jax.block_until_ready(
        squeeze_excitation(x, w1, w2, max_block_bytes=4096))
    assert jnp.allclose(out2, ref, atol=1e-5, rtol=1e-5)

    # 3) Non-128-multiple spatial map (7x7) -> masked-store path, still correct.
    x7 = jax.random.normal(kx2, (N, C, 7, 7), dtype=jnp.float32)
    out3 = jax.block_until_ready(squeeze_excitation(x7, w1, w2))
    assert jnp.allclose(out3, _reference(x7, w1, w2), atol=1e-5, rtol=1e-5)

    print("KERNEL_OK")
</pallas_src>

<mosaic_0001>
module attributes {stable_mosaic.version = 11 : i64} {
  func.func @_se_kernel(%arg0: i32, %arg1: memref<1x8x256xf32, #tpu.memory_space<vmem>>, %arg2: memref<8x2xf32, #tpu.memory_space<vmem>>, %arg3: memref<2x8xf32, #tpu.memory_space<vmem>>, %arg4: memref<1x8x256xf32, #tpu.memory_space<vmem>>) attributes {dimension_semantics = [#tpu.dimension_semantics<parallel>], iteration_bounds = array<i64: 2>, scalar_prefetch = 0 : i64, scratch_operands = 0 : i64, tpu.core_type = #tpu.core_type<tc>, window_params = [{transform_indices = @transform_0, window_bounds = array<i64: 1, 8, 256>}, {pipeline_mode = #tpu.pipeline_mode<synchronous>, transform_indices = @transform_1, window_bounds = array<i64: 8, 2>}, {pipeline_mode = #tpu.pipeline_mode<synchronous>, transform_indices = @transform_2, window_bounds = array<i64: 2, 8>}, {transform_indices = @transform_3, window_bounds = array<i64: 1, 8, 256>}]} {
    %c0 = arith.constant 0 : index
    %c0_0 = arith.constant 0 : index
    %c0_1 = arith.constant 0 : index
    %0 = vector.load %arg1[%c0, %c0_0, %c0_1] : memref<1x8x256xf32, #tpu.memory_space<vmem>>, vector<1x8x256xf32>
    %cst = arith.constant dense<0.000000e+00> : vector<1x8xf32>
    %1 = vector.multi_reduction <add>, %0, %cst [2] : vector<1x8x256xf32> to vector<1x8xf32>
    %cst_2 = arith.constant 2.560000e+02 : f32
    %2 = vector.broadcast %cst_2 : f32 to vector<1x8xf32>
    %3 = arith.divf %1, %2 : vector<1x8xf32>
    %c0_3 = arith.constant 0 : index
    %c0_4 = arith.constant 0 : index
    %4 = vector.load %arg2[%c0_3, %c0_4] : memref<8x2xf32, #tpu.memory_space<vmem>>, vector<8x2xf32>
    %cst_5 = arith.constant dense<0.000000e+00> : vector<1x2xf32>
    %5 = tpu.matmul %3, %4, %cst_5 {dimension_numbers = #tpu.dot_dimension_numbers<[1], [0], [0], [1], [0, 0, 1, 1], [], []>} : vector<1x8xf32>, vector<8x2xf32>, vector<1x2xf32> -> vector<1x2xf32>
    %cst_6 = arith.constant 0.000000e+00 : f32
    %6 = vector.broadcast %cst_6 : f32 to vector<1x2xf32>
    %7 = arith.maximumf %5, %6 : vector<1x2xf32>
    %c0_7 = arith.constant 0 : index
    %c0_8 = arith.constant 0 : index
    %8 = vector.load %arg3[%c0_7, %c0_8] : memref<2x8xf32, #tpu.memory_space<vmem>>, vector<2x8xf32>
    %cst_9 = arith.constant dense<0.000000e+00> : vector<1x8xf32>
    %9 = tpu.matmul %7, %8, %cst_9 {dimension_numbers = #tpu.dot_dimension_numbers<[1], [0], [0], [1], [0, 0, 1, 1], [], []>} : vector<1x2xf32>, vector<2x8xf32>, vector<1x8xf32> -> vector<1x8xf32>
    %10 = arith.negf %9 : vector<1x8xf32>
    %11 = math.exp %10 : vector<1x8xf32>
    %cst_10 = arith.constant 1.000000e+00 : f32
    %12 = vector.broadcast %cst_10 : f32 to vector<1x8xf32>
    %13 = arith.addf %12, %11 : vector<1x8xf32>
    %14 = arith.divf %12, %13 : vector<1x8xf32>
    %15 = vector.shape_cast %14 : vector<1x8xf32> to vector<1x8x1xf32>
    %16 = vector.broadcast %15 : vector<1x8x1xf32> to vector<1x8x256xf32>
    %17 = arith.mulf %0, %16 : vector<1x8x256xf32>
    %c0_11 = arith.constant 0 : index
    %c0_12 = arith.constant 0 : index
    %c0_13 = arith.constant 0 : index
    %18 = vector.load %arg4[%c0_11, %c0_12, %c0_13] : memref<1x8x256xf32, #tpu.memory_space<vmem>>, vector<1x8x256xf32>
    tpu.vector_store %arg4[%c0_11, %c0_12, %c0_13], %17 {strides = array<i32>} : memref<1x8x256xf32, #tpu.memory_space<vmem>>, vector<1x8x256xf32>,
    return
  }
  func.func @transform_0(%arg0: i32) -> (i32, i32, i32) {
    %c0_i32 = arith.constant 0 : i32
    %c0_i32_0 = arith.constant 0 : i32
    %c0_i32_1 = arith.constant 0 : i32
    return %arg0, %c0_i32, %c0_i32_0 : i32, i32, i32
  }
  func.func @transform_1(%arg0: i32) -> (i32, i32) {
    %c0_i32 = arith.constant 0 : i32
    %c0_i32_0 = arith.constant 0 : i32
    %c0_i32_1 = arith.constant 0 : i32
    return %c0_i32, %c0_i32_0 : i32, i32
  }
  func.func @transform_2(%arg0: i32) -> (i32, i32) {
    %c0_i32 = arith.constant 0 : i32
    %c0_i32_0 = arith.constant 0 : i32
    %c0_i32_1 = arith.constant 0 : i32
    return %c0_i32, %c0_i32_0 : i32, i32
  }
  func.func @transform_3(%arg0: i32) -> (i32, i32, i32) {
    %c0_i32 = arith.constant 0 : i32
    %c0_i32_0 = arith.constant 0 : i32
    %c0_i32_1 = arith.constant 0 : i32
    return %arg0, %c0_i32, %c0_i32_0 : i32, i32, i32
  }
}

</mosaic_0001>

<bundles_post_ra>
// kernel: tpu_custom_call.1
= control target key start
LH: loop header
LB: loop body
LE: loop exit
PB: predicated region body
PF: predicated region fallthrough
CT: control target
= control target key end

     0   :  { %8 = vsyncpa [#allocation3], 0  ;;  %s836_s0 = inlined_call_operand.hbm [shape: f32[2,8,256], index: 0, kind: input, shape index: {}]   ;;  %s837_s1 = inlined_call_operand.vmem [shape: f32[8,2], index: 1, kind: input, shape index: {}]   ;;  %s838_s2 = inlined_call_operand.vmem [shape: f32[2,8], index: 2, kind: input, shape index: {}]   ;;  %s839_s3 = inlined_call_operand.hbm [shape: f32[2,8,256], index: 3, kind: output, shape index: {}]  }
   0x1   :  { %10 = vsyncpa [#allocation3 + $0x1], 0 }
   0x2   :  { %11 = vsyncpa [#allocation4], 0 }
   0x3   :  { %13 = vsyncpa [#allocation4 + $0x1], 0  ;;  %s665_s12 = smov 0   ;;  %s667_s13 = smov 0  }
   0x4   :  { %s669_s14 = smov 0   ;;  %s671_s15 = smov 0  }
   0x5 LB: > { %s686_s16 = sadd.s32 4294967295, %s639_s15   ;;  %s457_s17 = sadd.s32 4294967294, %s639_s15   ;;  %s639_s15 = sphi %s671_s15, %s854_s15   ;;  %s635_s14 = sphi %s669_s14, %s853_s14   ;;  %s631_s13 = sphi %s667_s13, %s852_s13   ;;  %s627_s12 = sphi %s665_s12, %s851_s12  }
   0x6   : > { %s690_s18 = sadd.s32 1, %s639_s15   ;;  %s26_s19 = sadd.s32 1, %s635_s14 }
   0x7   : > { %s23_s20 = ssub.s32 %s639_s15, %s690_s18  ;;  %p33_p0 = scmp.ne.s32.totalorder %s635_s14, %s631_s13 }
   0x8   : > { %p24_p1 = scmp.eq.s32.totalorder %s23_s20, 0  ;;  %p34_p2 = scmp.eq.s32.totalorder %s639_s15, 0 }
   0x9   : > { %p39_p3 = scmp.ne.s32.totalorder %s631_s13, %s627_s12  ;;  %p40_p4 = scmp.eq.s32.totalorder %s686_s16, 0 }
   0xa   : > { %s702_s21 = scalar_select %p24_p1, %s635_s14, %s26_s19  }
   0xb   : > { %p704_p5 = por %p34_p2, %p33_p0  ;;  %p708_p6 = por %p40_p4, %p39_p3 }
   0xc   : > { %p105_p7 = scmp.eq.s32.totalorder %s686_s16, 1  ;;  %p111_p8 = scmp.eq.s32.totalorder %s457_s17, 1 }
   0xd   : > { %p503_p10 = scmp.lt.s32.totalorder %s639_s15, 2  ;;  %s137_s26 = sand.u32 1, %s635_s14  }
   0xe   : > { %p715_p11 = por %p105_p7, %p33_p0  ;;  %p719_p12 = por %p111_p8, %p39_p3 }
   0xf   : > { %s475_s27 = sshll.u32 %s639_s15, 8  ;;  %s460_s28 = sshll.u32 %s137_s26, 4 }
  0x10   : > { %s843_s24 = scalar_select %p715_p11, 1, 0 }
  0x11   : > { %s844_s25 = scalar_select %p719_p12, 1, 0 }
  0x12   : > { %s728_s4 = scalar_lea.hbm %s836_s0, %s475_s27  ;;  %s141_s5 = scalar_lea.vmem [#allocation2], %s460_s28 }
  0x13   : > { %s149_s6 = sshll.u32 %s141_s5, 4  ;;  %p732_p13 = pnand %p503_p10, %p704_p5  ;;  %s736_s6 = int_to_ptr.vmem [resolvable:$true] %s149_s6 }
  0x14   : > { %s138_s8 = scalar_lea.sflag [#allocation3], %s137_s26  ;;  %s543_s9 = scalar_lea.hbm %s728_s4, 256 }
  0x15   : > { %p544_p2 = scmp.ne.s32.totalorder %s728_s4, %s543_s9  ;;  %p545_p3 = pneg %p732_p13 }
  0x16   : > { %s548_s17 = scalar_lea.hbm %s836_s0, 512  ;;  %p549_p5 = scmp.lt.u32.totalorder %s728_s4, %s836_s0 }
  0x17   : > { %p546_p4 = pnand %p545_p3, %p544_p2  ;;  %p550_p8 = scmp.lt.u32.totalorder %s548_s17, %s543_s9 }
  0x18   : > { %p552_p9 = scmp.lt.u32.totalorder %s543_s9, %s728_s4 }
  0x19   : > { %p547_p7 = pneg %p546_p4  ;;  %p551_p10 = por %p550_p8, %p549_p5 }
  0x1b   : > { %p553_p0 = por %p552_p9, %p551_p10 }
  0x1d   : > { %p554_p1 = pnand %p553_p0, %p547_p7 }
  0x1f   : > { %557 = shalt.err (!%p554_p1)
}
  0x20   : > { %s558_s22 = scalar_lea.vmem %s736_s6, 256  ;;  %s641_s26 = smov [#allocation2]  }
  0x21   : > { %p559_p2 = scmp.ne.s32.totalorder %s736_s6, %s558_s22  ;;  %s563_s27 = sshll.u32 %s641_s26, 4  ;;  %s564_s27 = int_to_ptr.vmem [resolvable:$false] %s563_s27 }
  0x22   : > { %s565_s28 = scalar_lea.vmem %s564_s27, 512  ;;  %p566_p11 = scmp.lt.s32.totalorder %s736_s6, %s564_s27 }
  0x23   : > { %p561_p4 = pnand %p559_p2, %p545_p3  ;;  %p567_p5 = scmp.lt.s32.totalorder %s565_s28, %s558_s22 }
  0x25   : > { %p562_p12 = pneg %p561_p4  ;;  %p568_p8 = por %p567_p5, %p566_p11 }
  0x27   : > { %p569_p9 = pnand %p568_p8, %p562_p12 }
  0x29   : > { %572 = shalt.err (!%p569_p9)
}
  0x2a   : > { %498 = dma.hbm_to_vmem [thread:$0]  (!%p732_p13), %s728_s4, 256, %s736_s6, %s138_s8  }
  0x2b   : > { %p846_p0 = scmp.lt.s32.totalorder %s639_s15, 3  ;;  %p847_p1 = scmp.ge.s32.totalorder %s639_s15, 1 }
  0x2d   : > { %p155_p3 = pnand %p847_p1, %p846_p0 }
  0x2e   : > { %s770_s29 = sand.u32 (!%p155_p3), 1, %s631_s13  }
  0x2f   : > { %158 = sbr.rel (%p155_p3) target bundleno = 789 (0x315), region = 32  ;;  %s464_s30 = sshll.u32 (!%p155_p3), %s770_s29, 4 }
  0x30   : > { %s161_s5 = scalar_lea.sflag (!%p155_p3), [#allocation3], %s770_s29  ;;  %s164_s7 = scalar_lea.vmem (!%p155_p3), [#allocation2], %s464_s30 }
  0x36   : > { %618 = dma.done.wait (%p708_p6), %s161_s5, 256  }
  0x37   : > { %620 = vsyncadd (%p708_p6), %s161_s5, 4294967040  ;;  %v187_v0 = vld [vmem:[%s164_s7] sm:$0xff]  ;;  %v188_v1 = vld [vmem:[%s164_s7 + $0x8] sm:$0xff]  ;;  %v642_v3 = vmov 0.0   ;;  %vm643_vm0 = vmmov 0   ;;  %v196_v5 = vlaneseq  ;;  %vm202_vm1 = vcmask 64512  }
  0x38   : > { %v189_v2 = vadd.f32 %v188_v1, %v187_v0  ;;  %481 = vmatprep.subr.mxu0 %v642_v3  ;;  %v194_v4 = vld [vmem:[%s837_s1] sm:$0xff]  ;;  %486 = vmatprep.subr.mxu1 %v642_v3  ;;  %vm281_vm2 = vcmask 1041408   ;;  %vm277_vm3 = vcmask 15360   ;;  %s476_s9 = sshll.u32 %s686_s16, 8  ;;  %s186_s10 = scalar_lea.vmem [#allocation5], %s464_s30 }
  0x39   : > { %482 = vmatpush3.msra.mxu0 %v194_v4  ;;  %483 = vmatprep.mubr.msk.f32.mxu0 %vm643_vm0, %v642_v3  ;;  %v197_v6 = vand.u32 127, %v196_v5  ;;  %v199_v7 = vshrl.u32 %v196_v5, 7  ;;  %v276_v12 = vld [vmem:[%s838_s2] sm:$0x3]  ;;  %s387_s11 = sshll.u32 %s186_s10, 4  ;;  %s792_s20 = scalar_lea.hbm %s839_s3, %s476_s9  ;;  %s794_s11 = int_to_ptr.vmem [resolvable:$true] %s387_s11 }
  0x3a   : > { %190 = vadd.xlane.f32.xlu0 %v189_v2  ;;  %488 = vmatprep.mubr.msk.f32.mxu1 %vm643_vm0, %v642_v3  ;;  %s373_s22 = scalar_lea.sflag [#allocation4], %s770_s29  ;;  %s573_s16 = scalar_lea.vmem %s794_s11, 256 }
  0x3b   : > { %v200_v8 = vsub.s32 %v197_v6, %v199_v7  ;;  %487 = vmatpush3.msk.msra.mxu1 %vm281_vm2, %v276_v12  ;;  %v363_v21 = vsub.s32 0, %v199_v7  ;;  %p574_p6 = scmp.ne.s32.totalorder %s794_s11, %s573_s16  ;;  %p848_p11 = scmp.ne.s32.totalorder %s843_s24, 0 }
  0x3c   : > { %s644_s26 = smov [#allocation5]  }
  0x3d   : > { %p575_p12 = pnand %p574_p6, %p848_p11  ;;  %s577_s27 = sshll.u32 %s644_s26, 4  ;;  %s578_s27 = int_to_ptr.vmem [resolvable:$false] %s577_s27 }
  0x3e   : > { %s579_s28 = scalar_lea.vmem %s578_s27, 512  ;;  %p580_p7 = scmp.lt.s32.totalorder %s794_s11, %s578_s27 }
  0x3f   : > { %p576_p13 = pneg %p575_p12  ;;  %p581_p10 = scmp.lt.s32.totalorder %s579_s28, %s573_s16 }
  0x41   : > { %p582_p2 = por %p581_p10, %p580_p7 }
  0x43   : > { %p583_p4 = pnand %p582_p2, %p576_p13 }
  0xc7   : > { %v191_v9 = vpop.xlane.xlu0 %190 }
  0xc8   : > { %v193_v10 = vmul.f32 0.00390625, %v191_v9 }
  0xca   : > { %v201_v11 = vrot.slane %v193_v10, %v200_v8 }
  0xcc   : > { %484 = vmatmul.mubr.msk.f32.vlgmr.msra.gmra.mrb[0].mxu0 %vm202_vm1, %v201_v11 }
 0x19f   : > { %v271_v13 = vpop.f32.mrb[0].mxu0 }
 0x1a0   : > { %v275_v14 = vmax.f32 %v271_v13, 0.0  ;;  %v485_v15 = vpop.f32.mrb[1].mxu0 }
 0x1a2   : > { %489 = vmatmul.mubr.msk.f32.vlgmr.msra.gmra.mrb[0].mxu1 %vm277_vm3, %v275_v14 }
 0x275   : > { %v351_v16 = vpop.f32.mrb[0].mxu1 }
 0x276   : > { %v469_v17 = vmul.f32 -1.442695, %v351_v16  ;;  %v490_v18 = vpop.f32.mrb[1].mxu1 }
 0x278   : > { %539 = vpow2.f32 %v469_v17 }
 0x282   : > { %v540_v19 = vpop.eup %539 }
 0x283   : > { %v358_v20 = vadd.f32 1.0, %v540_v19 }
 0x285   : > { %541 = vrcp.f32 %v358_v20 }
 0x28f   : > { %v542_v22 = vpop.eup %541 }
 0x290   : > { %v364_v23 = vrot.slane %v542_v22, %v363_v21 }
 0x292   : > { %366 = vbcast.lane.b32.xlu0 %v364_v23, 256 }
 0x304   : > { %v367_v24 = vpop.permute.xlu0 %366 }
 0x305   : > { %v368_v25 = vmul.f32 %v367_v24, %v187_v0  ;;  %v369_v26 = vmul.f32 %v367_v24, %v188_v1 }
 0x307   : > { %370 = vst [vmem:[%s186_s10] sm:$0xff] %v368_v25  ;;  %371 = vst [vmem:[%s186_s10 + $0x8] sm:$0xff] %v369_v26 }
 0x308   : > { %586 = shalt.err (!%p583_p4)
}
 0x309   : > { %s587_s29 = scalar_lea.hbm %s792_s20, 256  ;;  %s591_s7 = scalar_lea.hbm %s839_s3, 512 }
 0x30a   : > { %p588_p5 = scmp.ne.s32.totalorder %s792_s20, %s587_s29  ;;  %p592_p0 = scmp.lt.u32.totalorder %s792_s20, %s839_s3 }
 0x30b   : > { %p593_p1 = scmp.lt.u32.totalorder %s591_s7, %s587_s29  ;;  %p595_p6 = scmp.lt.u32.totalorder %s587_s29, %s792_s20 }
 0x30c   : > { %p589_p8 = pnand %p588_p5, %p848_p11 }
 0x30d   : > { %p594_p3 = por %p593_p1, %p592_p0 }
 0x30e   : > { %p590_p9 = pneg %p589_p8 }
 0x30f   : > { %p596_p12 = por %p595_p6, %p594_p3 }
 0x311   : > { %p597_p13 = pnand %p596_p12, %p590_p9 }
 0x313   : > { %600 = shalt.err (!%p597_p13)
}
 0x314   : > { %493 = dma.vmem_to_hbm [thread:$0]  (%p848_p11), %s794_s11, 256, %s792_s20, %s373_s22  }
 0x315 PF: > { %s399_s23 = sand.u32 1, %s627_s12   ;;  %p849_p7 = scmp.ne.s32.totalorder %s844_s25, 0 }
 0x316   : > { %p850_p10 = scmp.ge.s32.totalorder %s639_s15, 2  ;;  %s400_s8 = scalar_lea.sflag [#allocation4], %s399_s23 }
 0x318   : > { %p500_p2 = pnand %p850_p10, %p849_p7 }
 0x31a   : > { %622 = dma.done.wait (!%p500_p2), %s400_s8, 256  }
 0x31b   : > { %624 = vsyncadd (!%p500_p2), %s400_s8, 4294967040  ;;  %p16_p4 = scmp.ge.s32.totalorder %s690_s18, 4   ;;  %s851_s12 = smov %s631_s13 }
 0x31c   : > { %s852_s13 = smov %s635_s14  ;;  %s853_s14 = smov %s702_s21 }
 0x31d   : > { %s854_s15 = smov %s690_s18  ;;  %18 = sbr.rel (!%p16_p4) target bundleno = 5 (0x5), region = 77 }
 0x324   :  { %405 = vsyncpa [#allocation3], 1 }
 0x325   :  { %407 = vsyncpa [#allocation3 + $0x1], 1 }
 0x326   :  { %408 = vsyncpa [#allocation4], 1 }
 0x327   :  { %410 = vsyncpa [#allocation4 + $0x1], 1 }

</bundles_post_ra>
